<compile_context>
chip_gen: v7x
topology: tpu7x:2x2x1
jax: 0.10.0
libtpu: 0.0.40
codegen_flags: <defaults>
</compile_context>

<pallas_src>
import jax
import jax.numpy as jnp
from jax import lax
from jax.experimental import pallas as pl
from jax.experimental.pallas import tpu as pltpu

NUM_TOKENS = 14


def _sigmoid(x):
    # EUP tanh + VPU mul/add; avoids a VALU divide on the gating critical path.
    return 0.5 * (jnp.tanh(0.5 * x) + 1.0)


def encoder_kernel(xp_ref, whh_ref, a_ref, h_scr):
    """Fused q/k LSTM recurrence + A = q @ k^T.

    xp_ref : (T, B, 8D)  precomputed per-token gate inputs (embed @ W_in + bias)
                          for both LSTMs, columns [i_q|i_k|f_q|f_k|g_q|g_k|o_q|o_k]
    whh_ref: (2D, 8D)    block-diagonal recurrent weight for packed state [h_q|h_k]
    a_ref  : (B, T, T)   output
    h_scr  : (T, B, 2D)  per-step hidden states [h_q|h_k], time-major
    """
    T, B, G = xp_ref.shape
    D2 = G // 4            # 2*D: width of the packed [q|k] state
    D = D2 // 2

    whh = whh_ref[...]     # hoisted weight load (reused every step)

    h0 = jnp.zeros((B, D2), jnp.float32)
    c0 = jnp.zeros((B, D2), jnp.float32)   # PyTorch default zero init

    def step(t, carry):
        h, c = carry
        # Single MXU push per timestep: (B, 2D) @ (2D, 8D).
        # Input projection and biases are already folded into xp_ref.
        gates = xp_ref[t] + jnp.dot(h, whh, preferred_element_type=jnp.float32)
        i = _sigmoid(gates[:, 0 * D2:1 * D2])
        f = _sigmoid(gates[:, 1 * D2:2 * D2])
        g = jnp.tanh(gates[:, 2 * D2:3 * D2])
        o = _sigmoid(gates[:, 3 * D2:4 * D2])
        c_new = f * c + i * g
        h_new = o * jnp.tanh(c_new)
        h_scr[t] = h_new
        return (h_new, c_new)

    # Fully unrolled: lets the scheduler overlap step t's gating with step t+1's matmul.
    lax.fori_loop(0, T, step, (h0, c0), unroll=True)

    # One transpose to batch-major, then a single batched MXU call for A = q @ k^T.
    hs = jnp.transpose(h_scr[...], (1, 0, 2))      # (B, T, 2D)
    q = hs[:, :, :D]                               # (B, T, D)
    k = hs[:, :, D:]                               # (B, T, D)
    a_ref[...] = jnp.einsum("btd,bsd->bts", q, k,
                            preferred_element_type=jnp.float32)


def _build_fused_params(params):
    """Fold embedding + input projections + biases into one per-token table and
    build the block-diagonal recurrent weight for the packed [h_q|h_k] state."""
    embed = params["embed"]                        # (14, D)
    D = embed.shape[1]
    Z = jnp.zeros((D, D), jnp.float32)

    in_cols, b_cols, hh_cols = [], [], []
    for g in range(4):                             # PyTorch gate order [i, f, g, o]
        sl = slice(g * D, (g + 1) * D)
        in_cols += [params["wih_q"][:, sl], params["wih_k"][:, sl]]
        b_cols += [params["b_q"][:, sl], params["b_k"][:, sl]]
        hh_cols += [jnp.concatenate([params["whh_q"][:, sl], Z], axis=0),
                    jnp.concatenate([Z, params["whh_k"][:, sl]], axis=0)]
    w_in = jnp.concatenate(in_cols, axis=1)        # (D, 8D)
    b_cat = jnp.concatenate(b_cols, axis=1)        # (1, 8D)
    w_hh = jnp.concatenate(hh_cols, axis=1)        # (2D, 8D) block-diagonal

    # The input-side gate contribution depends only on the token id (14 ids),
    # so precompute it once as a tiny table.
    xp_table = embed @ w_in + b_cat                # (14, 8D)
    return xp_table, w_hh


@jax.jit
def encoder_forward(tokens, params):
    B, T = tokens.shape
    D = params["embed"].shape[1]

    xp_table, w_hh = _build_fused_params(params)
    xp = jnp.transpose(xp_table[tokens], (1, 0, 2))   # (T, B, 8D), time-major

    return pl.pallas_call(
        encoder_kernel,
        out_shape=jax.ShapeDtypeStruct((B, T, T), jnp.float32),
        in_specs=[pl.BlockSpec(memory_space=pltpu.MemorySpace.VMEM)] * 2,
        out_specs=pl.BlockSpec(memory_space=pltpu.MemorySpace.VMEM),
        scratch_shapes=[
            pltpu.VMEM((T, B, 2 * D), jnp.float32),   # packed [h_q|h_k] per step
        ],
    )(xp, w_hh)


# ---------------- pure-JAX reference (for correctness check) ----------------

def _lstm_ref(x_btd, wih_t, whh_t, b, D):
    B, T, _ = x_btd.shape

    def step(carry, x_t):
        h, c = carry
        gates = x_t @ wih_t + h @ whh_t + b
        i = jax.nn.sigmoid(gates[:, :D])
        f = jax.nn.sigmoid(gates[:, D:2 * D])
        g = jnp.tanh(gates[:, 2 * D:3 * D])
        o = jax.nn.sigmoid(gates[:, 3 * D:])
        c = f * c + i * g
        h = o * jnp.tanh(c)
        return (h, c), h

    h0 = jnp.zeros((B, D), jnp.float32)
    c0 = jnp.zeros((B, D), jnp.float32)
    _, hs = lax.scan(step, (h0, c0), jnp.transpose(x_btd, (1, 0, 2)))
    return jnp.transpose(hs, (1, 0, 2))


def encoder_ref(tokens, params):
    D = params["embed"].shape[1]
    emb = params["embed"][tokens]
    q = _lstm_ref(emb, params["wih_q"], params["whh_q"], params["b_q"], D)
    k = _lstm_ref(emb, params["wih_k"], params["whh_k"], params["b_k"], D)
    return jnp.einsum("btd,bsd->bts", q, k)


# ---------------- parameter init (deterministic, PyTorch-style) ----------------

def init_params(key, dim):
    ks = jax.random.split(key, 9)
    bound = 1.0 / jnp.sqrt(dim)

    def unif(k, shape):
        return jax.random.uniform(k, shape, jnp.float32, -bound, bound)

    embed = jax.random.normal(ks[0], (NUM_TOKENS, dim), jnp.float32)

    # PyTorch stores weight_ih (4D, D); we keep its transpose (D, 4D).
    wih_q = unif(ks[1], (4 * dim, dim)).T
    whh_q = unif(ks[2], (4 * dim, dim)).T
    b_q = (unif(ks[3], (4 * dim,)) + unif(ks[4], (4 * dim,))).reshape(1, 4 * dim)

    wih_k = unif(ks[5], (4 * dim, dim)).T
    whh_k = unif(ks[6], (4 * dim, dim)).T
    b_k = (unif(ks[7], (4 * dim,)) + unif(ks[8], (4 * dim,))).reshape(1, 4 * dim)

    return dict(embed=embed,
                wih_q=wih_q, whh_q=whh_q, b_q=b_q,
                wih_k=wih_k, whh_k=whh_k, b_k=b_k)


if __name__ == "__main__":
    B, T, D = 2, 8, 32
    root = jax.random.PRNGKey(0)
    k_params, k_tok = jax.random.split(root)

    params = init_params(k_params, D)
    tokens = jax.random.randint(k_tok, (B, T), 0, NUM_TOKENS, dtype=jnp.int32)

    A = encoder_forward(tokens, params)
    A = jax.block_until_ready(A)

    A_ref = encoder_ref(tokens, params)
    assert A.shape == (B, T, T)
    assert jnp.allclose(A, A_ref, atol=1e-2, rtol=1e-2), "mismatch vs JAX reference"

    print("KERNEL_OK")
</pallas_src>

<mosaic_0001>
module attributes {stable_mosaic.version = 11 : i64} {
  func.func @encoder_kernel(%arg0: memref<8x2x256xf32, #tpu.memory_space<vmem>>, %arg1: memref<64x256xf32, #tpu.memory_space<vmem>>, %arg2: memref<2x8x8xf32, #tpu.memory_space<vmem>>, %arg3: memref<8x2x64xf32, #tpu.memory_space<vmem>>) attributes {dimension_semantics = [], scalar_prefetch = 0 : i64, scratch_operands = 1 : i64, tpu.core_type = #tpu.core_type<tc>} {
    %c0 = arith.constant 0 : index
    %c0_0 = arith.constant 0 : index
    %0 = vector.load %arg1[%c0, %c0_0] : memref<64x256xf32, #tpu.memory_space<vmem>>, vector<64x256xf32>
    %cst = arith.constant 0.000000e+00 : f32
    %1 = vector.broadcast %cst : f32 to vector<2x64xf32>
    %cst_1 = arith.constant 0.000000e+00 : f32
    %2 = vector.broadcast %cst_1 : f32 to vector<2x64xf32>
    %c0_i32 = arith.constant 0 : i32
    %3 = arith.index_cast %c0_i32 : i32 to index
    %c0_2 = arith.constant 0 : index
    %c0_3 = arith.constant 0 : index
    %4 = vector.load %arg0[%3, %c0_2, %c0_3] : memref<8x2x256xf32, #tpu.memory_space<vmem>>, vector<1x2x256xf32>
    %5 = vector.shape_cast %4 : vector<1x2x256xf32> to vector<2x256xf32>
    %cst_4 = arith.constant dense<0.000000e+00> : vector<2x256xf32>
    %6 = tpu.matmul %1, %0, %cst_4 {dimension_numbers = #tpu.dot_dimension_numbers<[1], [0], [0], [1], [0, 0, 1, 1], [], []>} : vector<2x64xf32>, vector<64x256xf32>, vector<2x256xf32> -> vector<2x256xf32>
    %7 = arith.addf %5, %6 : vector<2x256xf32>
    %8 = vector.extract_strided_slice %7 {offsets = [0, 0], sizes = [2, 64], strides = [1, 1]} : vector<2x256xf32> to vector<2x64xf32>
    %cst_5 = arith.constant 5.000000e-01 : f32
    %9 = vector.broadcast %cst_5 : f32 to vector<2x64xf32>
    %10 = arith.mulf %9, %8 : vector<2x64xf32>
    %11 = math.tanh %10 : vector<2x64xf32>
    %cst_6 = arith.constant 1.000000e+00 : f32
    %12 = vector.broadcast %cst_6 : f32 to vector<2x64xf32>
    %13 = arith.addf %11, %12 : vector<2x64xf32>
    %cst_7 = arith.constant 5.000000e-01 : f32
    %14 = vector.broadcast %cst_7 : f32 to vector<2x64xf32>
    %15 = arith.mulf %14, %13 : vector<2x64xf32>
    %16 = vector.extract_strided_slice %7 {offsets = [0, 64], sizes = [2, 64], strides = [1, 1]} : vector<2x256xf32> to vector<2x64xf32>
    %cst_8 = arith.constant 5.000000e-01 : f32
    %17 = vector.broadcast %cst_8 : f32 to vector<2x64xf32>
    %18 = arith.mulf %17, %16 : vector<2x64xf32>
    %19 = math.tanh %18 : vector<2x64xf32>
    %cst_9 = arith.constant 1.000000e+00 : f32
    %20 = vector.broadcast %cst_9 : f32 to vector<2x64xf32>
    %21 = arith.addf %19, %20 : vector<2x64xf32>
    %cst_10 = arith.constant 5.000000e-01 : f32
    %22 = vector.broadcast %cst_10 : f32 to vector<2x64xf32>
    %23 = arith.mulf %22, %21 : vector<2x64xf32>
    %24 = vector.extract_strided_slice %7 {offsets = [0, 128], sizes = [2, 64], strides = [1, 1]} : vector<2x256xf32> to vector<2x64xf32>
    %25 = math.tanh %24 : vector<2x64xf32>
    %26 = vector.extract_strided_slice %7 {offsets = [0, 192], sizes = [2, 64], strides = [1, 1]} : vector<2x256xf32> to vector<2x64xf32>
    %cst_11 = arith.constant 5.000000e-01 : f32
    %27 = vector.broadcast %cst_11 : f32 to vector<2x64xf32>
    %28 = arith.mulf %27, %26 : vector<2x64xf32>
    %29 = math.tanh %28 : vector<2x64xf32>
    %cst_12 = arith.constant 1.000000e+00 : f32
    %30 = vector.broadcast %cst_12 : f32 to vector<2x64xf32>
    %31 = arith.addf %29, %30 : vector<2x64xf32>
    %cst_13 = arith.constant 5.000000e-01 : f32
    %32 = vector.broadcast %cst_13 : f32 to vector<2x64xf32>
    %33 = arith.mulf %32, %31 : vector<2x64xf32>
    %34 = arith.mulf %23, %2 : vector<2x64xf32>
    %35 = arith.mulf %15, %25 : vector<2x64xf32>
    %36 = arith.addf %34, %35 : vector<2x64xf32>
    %37 = math.tanh %36 : vector<2x64xf32>
    %38 = arith.mulf %33, %37 : vector<2x64xf32>
    %39 = arith.index_cast %c0_i32 : i32 to index
    %c0_14 = arith.constant 0 : index
    %c0_15 = arith.constant 0 : index
    %40 = vector.load %arg3[%39, %c0_14, %c0_15] : memref<8x2x64xf32, #tpu.memory_space<vmem>>, vector<1x2x64xf32>
    %41 = vector.shape_cast %40 : vector<1x2x64xf32> to vector<2x64xf32>
    %42 = vector.shape_cast %38 : vector<2x64xf32> to vector<1x2x64xf32>
    tpu.vector_store %arg3[%39, %c0_14, %c0_15], %42 {strides = array<i32>} : memref<8x2x64xf32, #tpu.memory_space<vmem>>, vector<1x2x64xf32>,
    %c1_i32 = arith.constant 1 : i32
    %43 = arith.index_cast %c1_i32 : i32 to index
    %c0_16 = arith.constant 0 : index
    %c0_17 = arith.constant 0 : index
    %44 = vector.load %arg0[%43, %c0_16, %c0_17] : memref<8x2x256xf32, #tpu.memory_space<vmem>>, vector<1x2x256xf32>
    %45 = vector.shape_cast %44 : vector<1x2x256xf32> to vector<2x256xf32>
    %cst_18 = arith.constant dense<0.000000e+00> : vector<2x256xf32>
    %46 = tpu.matmul %38, %0, %cst_18 {dimension_numbers = #tpu.dot_dimension_numbers<[1], [0], [0], [1], [0, 0, 1, 1], [], []>} : vector<2x64xf32>, vector<64x256xf32>, vector<2x256xf32> -> vector<2x256xf32>
    %47 = arith.addf %45, %46 : vector<2x256xf32>
    %48 = vector.extract_strided_slice %47 {offsets = [0, 0], sizes = [2, 64], strides = [1, 1]} : vector<2x256xf32> to vector<2x64xf32>
    %cst_19 = arith.constant 5.000000e-01 : f32
    %49 = vector.broadcast %cst_19 : f32 to vector<2x64xf32>
    %50 = arith.mulf %49, %48 : vector<2x64xf32>
    %51 = math.tanh %50 : vector<2x64xf32>
    %cst_20 = arith.constant 1.000000e+00 : f32
    %52 = vector.broadcast %cst_20 : f32 to vector<2x64xf32>
    %53 = arith.addf %51, %52 : vector<2x64xf32>
    %cst_21 = arith.constant 5.000000e-01 : f32
    %54 = vector.broadcast %cst_21 : f32 to vector<2x64xf32>
    %55 = arith.mulf %54, %53 : vector<2x64xf32>
    %56 = vector.extract_strided_slice %47 {offsets = [0, 64], sizes = [2, 64], strides = [1, 1]} : vector<2x256xf32> to vector<2x64xf32>
    %cst_22 = arith.constant 5.000000e-01 : f32
    %57 = vector.broadcast %cst_22 : f32 to vector<2x64xf32>
    %58 = arith.mulf %57, %56 : vector<2x64xf32>
    %59 = math.tanh %58 : vector<2x64xf32>
    %cst_23 = arith.constant 1.000000e+00 : f32
    %60 = vector.broadcast %cst_23 : f32 to vector<2x64xf32>
    %61 = arith.addf %59, %60 : vector<2x64xf32>
    %cst_24 = arith.constant 5.000000e-01 : f32
    %62 = vector.broadcast %cst_24 : f32 to vector<2x64xf32>
    %63 = arith.mulf %62, %61 : vector<2x64xf32>
    %64 = vector.extract_strided_slice %47 {offsets = [0, 128], sizes = [2, 64], strides = [1, 1]} : vector<2x256xf32> to vector<2x64xf32>
    %65 = math.tanh %64 : vector<2x64xf32>
    %66 = vector.extract_strided_slice %47 {offsets = [0, 192], sizes = [2, 64], strides = [1, 1]} : vector<2x256xf32> to vector<2x64xf32>
    %cst_25 = arith.constant 5.000000e-01 : f32
    %67 = vector.broadcast %cst_25 : f32 to vector<2x64xf32>
    %68 = arith.mulf %67, %66 : vector<2x64xf32>
    %69 = math.tanh %68 : vector<2x64xf32>
    %cst_26 = arith.constant 1.000000e+00 : f32
    %70 = vector.broadcast %cst_26 : f32 to vector<2x64xf32>
    %71 = arith.addf %69, %70 : vector<2x64xf32>
    %cst_27 = arith.constant 5.000000e-01 : f32
    %72 = vector.broadcast %cst_27 : f32 to vector<2x64xf32>
    %73 = arith.mulf %72, %71 : vector<2x64xf32>
    %74 = arith.mulf %63, %36 : vector<2x64xf32>
    %75 = arith.mulf %55, %65 : vector<2x64xf32>
    %76 = arith.addf %74, %75 : vector<2x64xf32>
    %77 = math.tanh %76 : vector<2x64xf32>
    %78 = arith.mulf %73, %77 : vector<2x64xf32>
    %79 = arith.index_cast %c1_i32 : i32 to index
    %c0_28 = arith.constant 0 : index
    %c0_29 = arith.constant 0 : index
    %80 = vector.load %arg3[%79, %c0_28, %c0_29] : memref<8x2x64xf32, #tpu.memory_space<vmem>>, vector<1x2x64xf32>
    %81 = vector.shape_cast %80 : vector<1x2x64xf32> to vector<2x64xf32>
    %82 = vector.shape_cast %78 : vector<2x64xf32> to vector<1x2x64xf32>
    tpu.vector_store %arg3[%79, %c0_28, %c0_29], %82 {strides = array<i32>} : memref<8x2x64xf32, #tpu.memory_space<vmem>>, vector<1x2x64xf32>,
    %c2_i32 = arith.constant 2 : i32
    %83 = arith.index_cast %c2_i32 : i32 to index
    %c0_30 = arith.constant 0 : index
    %c0_31 = arith.constant 0 : index
    %84 = vector.load %arg0[%83, %c0_30, %c0_31] : memref<8x2x256xf32, #tpu.memory_space<vmem>>, vector<1x2x256xf32>
    %85 = vector.shape_cast %84 : vector<1x2x256xf32> to vector<2x256xf32>
    %cst_32 = arith.constant dense<0.000000e+00> : vector<2x256xf32>
    %86 = tpu.matmul %78, %0, %cst_32 {dimension_numbers = #tpu.dot_dimension_numbers<[1], [0], [0], [1], [0, 0, 1, 1], [], []>} : vector<2x64xf32>, vector<64x256xf32>, vector<2x256xf32> -> vector<2x256xf32>
    %87 = arith.addf %85, %86 : vector<2x256xf32>
    %88 = vector.extract_strided_slice %87 {offsets = [0, 0], sizes = [2, 64], strides = [1, 1]} : vector<2x256xf32> to vector<2x64xf32>
    %cst_33 = arith.constant 5.000000e-01 : f32
    %89 = vector.broadcast %cst_33 : f32 to vector<2x64xf32>
    %90 = arith.mulf %89, %88 : vector<2x64xf32>
    %91 = math.tanh %90 : vector<2x64xf32>
    %cst_34 = arith.constant 1.000000e+00 : f32
    %92 = vector.broadcast %cst_34 : f32 to vector<2x64xf32>
    %93 = arith.addf %91, %92 : vector<2x64xf32>
    %cst_35 = arith.constant 5.000000e-01 : f32
    %94 = vector.broadcast %cst_35 : f32 to vector<2x64xf32>
    %95 = arith.mulf %94, %93 : vector<2x64xf32>
    %96 = vector.extract_strided_slice %87 {offsets = [0, 64], sizes = [2, 64], strides = [1, 1]} : vector<2x256xf32> to vector<2x64xf32>
    %cst_36 = arith.constant 5.000000e-01 : f32
    %97 = vector.broadcast %cst_36 : f32 to vector<2x64xf32>
    %98 = arith.mulf %97, %96 : vector<2x64xf32>
    %99 = math.tanh %98 : vector<2x64xf32>
    %cst_37 = arith.constant 1.000000e+00 : f32
    %100 = vector.broadcast %cst_37 : f32 to vector<2x64xf32>
    %101 = arith.addf %99, %100 : vector<2x64xf32>
    %cst_38 = arith.constant 5.000000e-01 : f32
    %102 = vector.broadcast %cst_38 : f32 to vector<2x64xf32>
    %103 = arith.mulf %102, %101 : vector<2x64xf32>
    %104 = vector.extract_strided_slice %87 {offsets = [0, 128], sizes = [2, 64], strides = [1, 1]} : vector<2x256xf32> to vector<2x64xf32>
    %105 = math.tanh %104 : vector<2x64xf32>
    %106 = vector.extract_strided_slice %87 {offsets = [0, 192], sizes = [2, 64], strides = [1, 1]} : vector<2x256xf32> to vector<2x64xf32>
    %cst_39 = arith.constant 5.000000e-01 : f32
    %107 = vector.broadcast %cst_39 : f32 to vector<2x64xf32>
    %108 = arith.mulf %107, %106 : vector<2x64xf32>
    %109 = math.tanh %108 : vector<2x64xf32>
    %cst_40 = arith.constant 1.000000e+00 : f32
    %110 = vector.broadcast %cst_40 : f32 to vector<2x64xf32>
    %111 = arith.addf %109, %110 : vector<2x64xf32>
    %cst_41 = arith.constant 5.000000e-01 : f32
    %112 = vector.broadcast %cst_41 : f32 to vector<2x64xf32>
    %113 = arith.mulf %112, %111 : vector<2x64xf32>
    %114 = arith.mulf %103, %76 : vector<2x64xf32>
    %115 = arith.mulf %95, %105 : vector<2x64xf32>
    %116 = arith.addf %114, %115 : vector<2x64xf32>
    %117 = math.tanh %116 : vector<2x64xf32>
    %118 = arith.mulf %113, %117 : vector<2x64xf32>
    %119 = arith.index_cast %c2_i32 : i32 to index
    %c0_42 = arith.constant 0 : index
    %c0_43 = arith.constant 0 : index
    %120 = vector.load %arg3[%119, %c0_42, %c0_43] : memref<8x2x64xf32, #tpu.memory_space<vmem>>, vector<1x2x64xf32>
    %121 = vector.shape_cast %120 : vector<1x2x64xf32> to vector<2x64xf32>
    %122 = vector.shape_cast %118 : vector<2x64xf32> to vector<1x2x64xf32>
    tpu.vector_store %arg3[%119, %c0_42, %c0_43], %122 {strides = array<i32>} : memref<8x2x64xf32, #tpu.memory_space<vmem>>, vector<1x2x64xf32>,
    %c3_i32 = arith.constant 3 : i32
    %123 = arith.index_cast %c3_i32 : i32 to index
    %c0_44 = arith.constant 0 : index
    %c0_45 = arith.constant 0 : index
    %124 = vector.load %arg0[%123, %c0_44, %c0_45] : memref<8x2x256xf32, #tpu.memory_space<vmem>>, vector<1x2x256xf32>
    %125 = vector.shape_cast %124 : vector<1x2x256xf32> to vector<2x256xf32>
    %cst_46 = arith.constant dense<0.000000e+00> : vector<2x256xf32>
    %126 = tpu.matmul %118, %0, %cst_46 {dimension_numbers = #tpu.dot_dimension_numbers<[1], [0], [0], [1], [0, 0, 1, 1], [], []>} : vector<2x64xf32>, vector<64x256xf32>, vector<2x256xf32> -> vector<2x256xf32>
    %127 = arith.addf %125, %126 : vector<2x256xf32>
    %128 = vector.extract_strided_slice %127 {offsets = [0, 0], sizes = [2, 64], strides = [1, 1]} : vector<2x256xf32> to vector<2x64xf32>
    %cst_47 = arith.constant 5.000000e-01 : f32
    %129 = vector.broadcast %cst_47 : f32 to vector<2x64xf32>
    %130 = arith.mulf %129, %128 : vector<2x64xf32>
    %131 = math.tanh %130 : vector<2x64xf32>
    %cst_48 = arith.constant 1.000000e+00 : f32
    %132 = vector.broadcast %cst_48 : f32 to vector<2x64xf32>
    %133 = arith.addf %131, %132 : vector<2x64xf32>
    %cst_49 = arith.constant 5.000000e-01 : f32
    %134 = vector.broadcast %cst_49 : f32 to vector<2x64xf32>
    %135 = arith.mulf %134, %133 : vector<2x64xf32>
    %136 = vector.extract_strided_slice %127 {offsets = [0, 64], sizes = [2, 64], strides = [1, 1]} : vector<2x256xf32> to vector<2x64xf32>
    %cst_50 = arith.constant 5.000000e-01 : f32
    %137 = vector.broadcast %cst_50 : f32 to vector<2x64xf32>
    %138 = arith.mulf %137, %136 : vector<2x64xf32>
    %139 = math.tanh %138 : vector<2x64xf32>
    %cst_51 = arith.constant 1.000000e+00 : f32
    %140 = vector.broadcast %cst_51 : f32 to vector<2x64xf32>
    %141 = arith.addf %139, %140 : vector<2x64xf32>
    %cst_52 = arith.constant 5.000000e-01 : f32
    %142 = vector.broadcast %cst_52 : f32 to vector<2x64xf32>
    %143 = arith.mulf %142, %141 : vector<2x64xf32>
    %144 = vector.extract_strided_slice %127 {offsets = [0, 128], sizes = [2, 64], strides = [1, 1]} : vector<2x256xf32> to vector<2x64xf32>
    %145 = math.tanh %144 : vector<2x64xf32>
    %146 = vector.extract_strided_slice %127 {offsets = [0, 192], sizes = [2, 64], strides = [1, 1]} : vector<2x256xf32> to vector<2x64xf32>
    %cst_53 = arith.constant 5.000000e-01 : f32
    %147 = vector.broadcast %cst_53 : f32 to vector<2x64xf32>
    %148 = arith.mulf %147, %146 : vector<2x64xf32>
    %149 = math.tanh %148 : vector<2x64xf32>
    %cst_54 = arith.constant 1.000000e+00 : f32
    %150 = vector.broadcast %cst_54 : f32 to vector<2x64xf32>
    %151 = arith.addf %149, %150 : vector<2x64xf32>
    %cst_55 = arith.constant 5.000000e-01 : f32
    %152 = vector.broadcast %cst_55 : f32 to vector<2x64xf32>
    %153 = arith.mulf %152, %151 : vector<2x64xf32>
    %154 = arith.mulf %143, %116 : vector<2x64xf32>
    %155 = arith.mulf %135, %145 : vector<2x64xf32>
    %156 = arith.addf %154, %155 : vector<2x64xf32>
    %157 = math.tanh %156 : vector<2x64xf32>
    %158 = arith.mulf %153, %157 : vector<2x64xf32>
    %159 = arith.index_cast %c3_i32 : i32 to index
    %c0_56 = arith.constant 0 : index
    %c0_57 = arith.constant 0 : index
    %160 = vector.load %arg3[%159, %c0_56, %c0_57] : memref<8x2x64xf32, #tpu.memory_space<vmem>>, vector<1x2x64xf32>
    %161 = vector.shape_cast %160 : vector<1x2x64xf32> to vector<2x64xf32>
    %162 = vector.shape_cast %158 : vector<2x64xf32> to vector<1x2x64xf32>
    tpu.vector_store %arg3[%159, %c0_56, %c0_57], %162 {strides = array<i32>} : memref<8x2x64xf32, #tpu.memory_space<vmem>>, vector<1x2x64xf32>,
    %c4_i32 = arith.constant 4 : i32
    %163 = arith.index_cast %c4_i32 : i32 to index
    %c0_58 = arith.constant 0 : index
    %c0_59 = arith.constant 0 : index
    %164 = vector.load %arg0[%163, %c0_58, %c0_59] : memref<8x2x256xf32, #tpu.memory_space<vmem>>, vector<1x2x256xf32>
    %165 = vector.shape_cast %164 : vector<1x2x256xf32> to vector<2x256xf32>
    %cst_60 = arith.constant dense<0.000000e+00> : vector<2x256xf32>
    %166 = tpu.matmul %158, %0, %cst_60 {dimension_numbers = #tpu.dot_dimension_numbers<[1], [0], [0], [1], [0, 0, 1, 1], [], []>} : vector<2x64xf32>, vector<64x256xf32>, vector<2x256xf32> -> vector<2x256xf32>
    %167 = arith.addf %165, %166 : vector<2x256xf32>
    %168 = vector.extract_strided_slice %167 {offsets = [0, 0], sizes = [2, 64], strides = [1, 1]} : vector<2x256xf32> to vector<2x64xf32>
    %cst_61 = arith.constant 5.000000e-01 : f32
    %169 = vector.broadcast %cst_61 : f32 to vector<2x64xf32>
    %170 = arith.mulf %169, %168 : vector<2x64xf32>
    %171 = math.tanh %170 : vector<2x64xf32>
    %cst_62 = arith.constant 1.000000e+00 : f32
    %172 = vector.broadcast %cst_62 : f32 to vector<2x64xf32>
    %173 = arith.addf %171, %172 : vector<2x64xf32>
    %cst_63 = arith.constant 5.000000e-01 : f32
    %174 = vector.broadcast %cst_63 : f32 to vector<2x64xf32>
    %175 = arith.mulf %174, %173 : vector<2x64xf32>
    %176 = vector.extract_strided_slice %167 {offsets = [0, 64], sizes = [2, 64], strides = [1, 1]} : vector<2x256xf32> to vector<2x64xf32>
    %cst_64 = arith.constant 5.000000e-01 : f32
    %177 = vector.broadcast %cst_64 : f32 to vector<2x64xf32>
    %178 = arith.mulf %177, %176 : vector<2x64xf32>
    %179 = math.tanh %178 : vector<2x64xf32>
    %cst_65 = arith.constant 1.000000e+00 : f32
    %180 = vector.broadcast %cst_65 : f32 to vector<2x64xf32>
    %181 = arith.addf %179, %180 : vector<2x64xf32>
    %cst_66 = arith.constant 5.000000e-01 : f32
    %182 = vector.broadcast %cst_66 : f32 to vector<2x64xf32>
    %183 = arith.mulf %182, %181 : vector<2x64xf32>
    %184 = vector.extract_strided_slice %167 {offsets = [0, 128], sizes = [2, 64], strides = [1, 1]} : vector<2x256xf32> to vector<2x64xf32>
    %185 = math.tanh %184 : vector<2x64xf32>
    %186 = vector.extract_strided_slice %167 {offsets = [0, 192], sizes = [2, 64], strides = [1, 1]} : vector<2x256xf32> to vector<2x64xf32>
    %cst_67 = arith.constant 5.000000e-01 : f32
    %187 = vector.broadcast %cst_67 : f32 to vector<2x64xf32>
    %188 = arith.mulf %187, %186 : vector<2x64xf32>
    %189 = math.tanh %188 : vector<2x64xf32>
    %cst_68 = arith.constant 1.000000e+00 : f32
    %190 = vector.broadcast %cst_68 : f32 to vector<2x64xf32>
    %191 = arith.addf %189, %190 : vector<2x64xf32>
    %cst_69 = arith.constant 5.000000e-01 : f32
    %192 = vector.broadcast %cst_69 : f32 to vector<2x64xf32>
    %193 = arith.mulf %192, %191 : vector<2x64xf32>
    %194 = arith.mulf %183, %156 : vector<2x64xf32>
    %195 = arith.mulf %175, %185 : vector<2x64xf32>
    %196 = arith.addf %194, %195 : vector<2x64xf32>
    %197 = math.tanh %196 : vector<2x64xf32>
    %198 = arith.mulf %193, %197 : vector<2x64xf32>
    %199 = arith.index_cast %c4_i32 : i32 to index
    %c0_70 = arith.constant 0 : index
    %c0_71 = arith.constant 0 : index
    %200 = vector.load %arg3[%199, %c0_70, %c0_71] : memref<8x2x64xf32, #tpu.memory_space<vmem>>, vector<1x2x64xf32>
    %201 = vector.shape_cast %200 : vector<1x2x64xf32> to vector<2x64xf32>
    %202 = vector.shape_cast %198 : vector<2x64xf32> to vector<1x2x64xf32>
    tpu.vector_store %arg3[%199, %c0_70, %c0_71], %202 {strides = array<i32>} : memref<8x2x64xf32, #tpu.memory_space<vmem>>, vector<1x2x64xf32>,
    %c5_i32 = arith.constant 5 : i32
    %203 = arith.index_cast %c5_i32 : i32 to index
    %c0_72 = arith.constant 0 : index
    %c0_73 = arith.constant 0 : index
    %204 = vector.load %arg0[%203, %c0_72, %c0_73] : memref<8x2x256xf32, #tpu.memory_space<vmem>>, vector<1x2x256xf32>
    %205 = vector.shape_cast %204 : vector<1x2x256xf32> to vector<2x256xf32>
    %cst_74 = arith.constant dense<0.000000e+00> : vector<2x256xf32>
    %206 = tpu.matmul %198, %0, %cst_74 {dimension_numbers = #tpu.dot_dimension_numbers<[1], [0], [0], [1], [0, 0, 1, 1], [], []>} : vector<2x64xf32>, vector<64x256xf32>, vector<2x256xf32> -> vector<2x256xf32>
    %207 = arith.addf %205, %206 : vector<2x256xf32>
    %208 = vector.extract_strided_slice %207 {offsets = [0, 0], sizes = [2, 64], strides = [1, 1]} : vector<2x256xf32> to vector<2x64xf32>
    %cst_75 = arith.constant 5.000000e-01 : f32
    %209 = vector.broadcast %cst_75 : f32 to vector<2x64xf32>
    %210 = arith.mulf %209, %208 : vector<2x64xf32>
    %211 = math.tanh %210 : vector<2x64xf32>
    %cst_76 = arith.constant 1.000000e+00 : f32
    %212 = vector.broadcast %cst_76 : f32 to vector<2x64xf32>
    %213 = arith.addf %211, %212 : vector<2x64xf32>
    %cst_77 = arith.constant 5.000000e-01 : f32
    %214 = vector.broadcast %cst_77 : f32 to vector<2x64xf32>
    %215 = arith.mulf %214, %213 : vector<2x64xf32>
    %216 = vector.extract_strided_slice %207 {offsets = [0, 64], sizes = [2, 64], strides = [1, 1]} : vector<2x256xf32> to vector<2x64xf32>
    %cst_78 = arith.constant 5.000000e-01 : f32
    %217 = vector.broadcast %cst_78 : f32 to vector<2x64xf32>
    %218 = arith.mulf %217, %216 : vector<2x64xf32>
    %219 = math.tanh %218 : vector<2x64xf32>
    %cst_79 = arith.constant 1.000000e+00 : f32
    %220 = vector.broadcast %cst_79 : f32 to vector<2x64xf32>
    %221 = arith.addf %219, %220 : vector<2x64xf32>
    %cst_80 = arith.constant 5.000000e-01 : f32
    %222 = vector.broadcast %cst_80 : f32 to vector<2x64xf32>
    %223 = arith.mulf %222, %221 : vector<2x64xf32>
    %224 = vector.extract_strided_slice %207 {offsets = [0, 128], sizes = [2, 64], strides = [1, 1]} : vector<2x256xf32> to vector<2x64xf32>
    %225 = math.tanh %224 : vector<2x64xf32>
    %226 = vector.extract_strided_slice %207 {offsets = [0, 192], sizes = [2, 64], strides = [1, 1]} : vector<2x256xf32> to vector<2x64xf32>
    %cst_81 = arith.constant 5.000000e-01 : f32
    %227 = vector.broadcast %cst_81 : f32 to vector<2x64xf32>
    %228 = arith.mulf %227, %226 : vector<2x64xf32>
    %229 = math.tanh %228 : vector<2x64xf32>
    %cst_82 = arith.constant 1.000000e+00 : f32
    %230 = vector.broadcast %cst_82 : f32 to vector<2x64xf32>
    %231 = arith.addf %229, %230 : vector<2x64xf32>
    %cst_83 = arith.constant 5.000000e-01 : f32
    %232 = vector.broadcast %cst_83 : f32 to vector<2x64xf32>
    %233 = arith.mulf %232, %231 : vector<2x64xf32>
    %234 = arith.mulf %223, %196 : vector<2x64xf32>
    %235 = arith.mulf %215, %225 : vector<2x64xf32>
    %236 = arith.addf %234, %235 : vector<2x64xf32>
    %237 = math.tanh %236 : vector<2x64xf32>
    %238 = arith.mulf %233, %237 : vector<2x64xf32>
    %239 = arith.index_cast %c5_i32 : i32 to index
    %c0_84 = arith.constant 0 : index
    %c0_85 = arith.constant 0 : index
    %240 = vector.load %arg3[%239, %c0_84, %c0_85] : memref<8x2x64xf32, #tpu.memory_space<vmem>>, vector<1x2x64xf32>
    %241 = vector.shape_cast %240 : vector<1x2x64xf32> to vector<2x64xf32>
    %242 = vector.shape_cast %238 : vector<2x64xf32> to vector<1x2x64xf32>
    tpu.vector_store %arg3[%239, %c0_84, %c0_85], %242 {strides = array<i32>} : memref<8x2x64xf32, #tpu.memory_space<vmem>>, vector<1x2x64xf32>,
    %c6_i32 = arith.constant 6 : i32
    %243 = arith.index_cast %c6_i32 : i32 to index
    %c0_86 = arith.constant 0 : index
    %c0_87 = arith.constant 0 : index
    %244 = vector.load %arg0[%243, %c0_86, %c0_87] : memref<8x2x256xf32, #tpu.memory_space<vmem>>, vector<1x2x256xf32>
    %245 = vector.shape_cast %244 : vector<1x2x256xf32> to vector<2x256xf32>
    %cst_88 = arith.constant dense<0.000000e+00> : vector<2x256xf32>
    %246 = tpu.matmul %238, %0, %cst_88 {dimension_numbers = #tpu.dot_dimension_numbers<[1], [0], [0], [1], [0, 0, 1, 1], [], []>} : vector<2x64xf32>, vector<64x256xf32>, vector<2x256xf32> -> vector<2x256xf32>
    %247 = arith.addf %245, %246 : vector<2x256xf32>
    %248 = vector.extract_strided_slice %247 {offsets = [0, 0], sizes = [2, 64], strides = [1, 1]} : vector<2x256xf32> to vector<2x64xf32>
    %cst_89 = arith.constant 5.000000e-01 : f32
    %249 = vector.broadcast %cst_89 : f32 to vector<2x64xf32>
    %250 = arith.mulf %249, %248 : vector<2x64xf32>
    %251 = math.tanh %250 : vector<2x64xf32>
    %cst_90 = arith.constant 1.000000e+00 : f32
    %252 = vector.broadcast %cst_90 : f32 to vector<2x64xf32>
    %253 = arith.addf %251, %252 : vector<2x64xf32>
    %cst_91 = arith.constant 5.000000e-01 : f32
    %254 = vector.broadcast %cst_91 : f32 to vector<2x64xf32>
    %255 = arith.mulf %254, %253 : vector<2x64xf32>
    %256 = vector.extract_strided_slice %247 {offsets = [0, 64], sizes = [2, 64], strides = [1, 1]} : vector<2x256xf32> to vector<2x64xf32>
    %cst_92 = arith.constant 5.000000e-01 : f32
    %257 = vector.broadcast %cst_92 : f32 to vector<2x64xf32>
    %258 = arith.mulf %257, %256 : vector<2x64xf32>
    %259 = math.tanh %258 : vector<2x64xf32>
    %cst_93 = arith.constant 1.000000e+00 : f32
    %260 = vector.broadcast %cst_93 : f32 to vector<2x64xf32>
    %261 = arith.addf %259, %260 : vector<2x64xf32>
    %cst_94 = arith.constant 5.000000e-01 : f32
    %262 = vector.broadcast %cst_94 : f32 to vector<2x64xf32>
    %263 = arith.mulf %262, %261 : vector<2x64xf32>
    %264 = vector.extract_strided_slice %247 {offsets = [0, 128], sizes = [2, 64], strides = [1, 1]} : vector<2x256xf32> to vector<2x64xf32>
    %265 = math.tanh %264 : vector<2x64xf32>
    %266 = vector.extract_strided_slice %247 {offsets = [0, 192], sizes = [2, 64], strides = [1, 1]} : vector<2x256xf32> to vector<2x64xf32>
    %cst_95 = arith.constant 5.000000e-01 : f32
    %267 = vector.broadcast %cst_95 : f32 to vector<2x64xf32>
    %268 = arith.mulf %267, %266 : vector<2x64xf32>
    %269 = math.tanh %268 : vector<2x64xf32>
    %cst_96 = arith.constant 1.000000e+00 : f32
    %270 = vector.broadcast %cst_96 : f32 to vector<2x64xf32>
    %271 = arith.addf %269, %270 : vector<2x64xf32>
    %cst_97 = arith.constant 5.000000e-01 : f32
    %272 = vector.broadcast %cst_97 : f32 to vector<2x64xf32>
    %273 = arith.mulf %272, %271 : vector<2x64xf32>
    %274 = arith.mulf %263, %236 : vector<2x64xf32>
    %275 = arith.mulf %255, %265 : vector<2x64xf32>
    %276 = arith.addf %274, %275 : vector<2x64xf32>
    %277 = math.tanh %276 : vector<2x64xf32>
    %278 = arith.mulf %273, %277 : vector<2x64xf32>
    %279 = arith.index_cast %c6_i32 : i32 to index
    %c0_98 = arith.constant 0 : index
    %c0_99 = arith.constant 0 : index
    %280 = vector.load %arg3[%279, %c0_98, %c0_99] : memref<8x2x64xf32, #tpu.memory_space<vmem>>, vector<1x2x64xf32>
    %281 = vector.shape_cast %280 : vector<1x2x64xf32> to vector<2x64xf32>
    %282 = vector.shape_cast %278 : vector<2x64xf32> to vector<1x2x64xf32>
    tpu.vector_store %arg3[%279, %c0_98, %c0_99], %282 {strides = array<i32>} : memref<8x2x64xf32, #tpu.memory_space<vmem>>, vector<1x2x64xf32>,
    %c7_i32 = arith.constant 7 : i32
    %283 = arith.index_cast %c7_i32 : i32 to index
    %c0_100 = arith.constant 0 : index
    %c0_101 = arith.constant 0 : index
    %284 = vector.load %arg0[%283, %c0_100, %c0_101] : memref<8x2x256xf32, #tpu.memory_space<vmem>>, vector<1x2x256xf32>
    %285 = vector.shape_cast %284 : vector<1x2x256xf32> to vector<2x256xf32>
    %cst_102 = arith.constant dense<0.000000e+00> : vector<2x256xf32>
    %286 = tpu.matmul %278, %0, %cst_102 {dimension_numbers = #tpu.dot_dimension_numbers<[1], [0], [0], [1], [0, 0, 1, 1], [], []>} : vector<2x64xf32>, vector<64x256xf32>, vector<2x256xf32> -> vector<2x256xf32>
    %287 = arith.addf %285, %286 : vector<2x256xf32>
    %288 = vector.extract_strided_slice %287 {offsets = [0, 0], sizes = [2, 64], strides = [1, 1]} : vector<2x256xf32> to vector<2x64xf32>
    %cst_103 = arith.constant 5.000000e-01 : f32
    %289 = vector.broadcast %cst_103 : f32 to vector<2x64xf32>
    %290 = arith.mulf %289, %288 : vector<2x64xf32>
    %291 = math.tanh %290 : vector<2x64xf32>
    %cst_104 = arith.constant 1.000000e+00 : f32
    %292 = vector.broadcast %cst_104 : f32 to vector<2x64xf32>
    %293 = arith.addf %291, %292 : vector<2x64xf32>
    %cst_105 = arith.constant 5.000000e-01 : f32
    %294 = vector.broadcast %cst_105 : f32 to vector<2x64xf32>
    %295 = arith.mulf %294, %293 : vector<2x64xf32>
    %296 = vector.extract_strided_slice %287 {offsets = [0, 64], sizes = [2, 64], strides = [1, 1]} : vector<2x256xf32> to vector<2x64xf32>
    %cst_106 = arith.constant 5.000000e-01 : f32
    %297 = vector.broadcast %cst_106 : f32 to vector<2x64xf32>
    %298 = arith.mulf %297, %296 : vector<2x64xf32>
    %299 = math.tanh %298 : vector<2x64xf32>
    %cst_107 = arith.constant 1.000000e+00 : f32
    %300 = vector.broadcast %cst_107 : f32 to vector<2x64xf32>
    %301 = arith.addf %299, %300 : vector<2x64xf32>
    %cst_108 = arith.constant 5.000000e-01 : f32
    %302 = vector.broadcast %cst_108 : f32 to vector<2x64xf32>
    %303 = arith.mulf %302, %301 : vector<2x64xf32>
    %304 = vector.extract_strided_slice %287 {offsets = [0, 128], sizes = [2, 64], strides = [1, 1]} : vector<2x256xf32> to vector<2x64xf32>
    %305 = math.tanh %304 : vector<2x64xf32>
    %306 = vector.extract_strided_slice %287 {offsets = [0, 192], sizes = [2, 64], strides = [1, 1]} : vector<2x256xf32> to vector<2x64xf32>
    %cst_109 = arith.constant 5.000000e-01 : f32
    %307 = vector.broadcast %cst_109 : f32 to vector<2x64xf32>
    %308 = arith.mulf %307, %306 : vector<2x64xf32>
    %309 = math.tanh %308 : vector<2x64xf32>
    %cst_110 = arith.constant 1.000000e+00 : f32
    %310 = vector.broadcast %cst_110 : f32 to vector<2x64xf32>
    %311 = arith.addf %309, %310 : vector<2x64xf32>
    %cst_111 = arith.constant 5.000000e-01 : f32
    %312 = vector.broadcast %cst_111 : f32 to vector<2x64xf32>
    %313 = arith.mulf %312, %311 : vector<2x64xf32>
    %314 = arith.mulf %303, %276 : vector<2x64xf32>
    %315 = arith.mulf %295, %305 : vector<2x64xf32>
    %316 = arith.addf %314, %315 : vector<2x64xf32>
    %317 = math.tanh %316 : vector<2x64xf32>
    %318 = arith.mulf %313, %317 : vector<2x64xf32>
    %319 = arith.index_cast %c7_i32 : i32 to index
    %c0_112 = arith.constant 0 : index
    %c0_113 = arith.constant 0 : index
    %320 = vector.load %arg3[%319, %c0_112, %c0_113] : memref<8x2x64xf32, #tpu.memory_space<vmem>>, vector<1x2x64xf32>
    %321 = vector.shape_cast %320 : vector<1x2x64xf32> to vector<2x64xf32>
    %322 = vector.shape_cast %318 : vector<2x64xf32> to vector<1x2x64xf32>
    tpu.vector_store %arg3[%319, %c0_112, %c0_113], %322 {strides = array<i32>} : memref<8x2x64xf32, #tpu.memory_space<vmem>>, vector<1x2x64xf32>,
    %c8_i32 = arith.constant 8 : i32
    %c0_114 = arith.constant 0 : index
    %c0_115 = arith.constant 0 : index
    %c0_116 = arith.constant 0 : index
    %323 = vector.load %arg3[%c0_114, %c0_115, %c0_116] : memref<8x2x64xf32, #tpu.memory_space<vmem>>, vector<8x2x64xf32>
    %324 = tpu.transpose %323, [1, 0, 2] : vector<8x2x64xf32> -> vector<2x8x64xf32>
    %325 = vector.extract_strided_slice %324 {offsets = [0, 0, 0], sizes = [2, 8, 32], strides = [1, 1, 1]} : vector<2x8x64xf32> to vector<2x8x32xf32>
    %326 = vector.extract_strided_slice %324 {offsets = [0, 0, 32], sizes = [2, 8, 32], strides = [1, 1, 1]} : vector<2x8x64xf32> to vector<2x8x32xf32>
    "tpu.trace_start"() <{level = 10 : i32, message = "btd,bsd->bts"}> : () -> ()
    %cst_117 = arith.constant dense<0.000000e+00> : vector<2x8x8xf32>
    %327 = tpu.matmul %325, %326, %cst_117 {dimension_numbers = #tpu.dot_dimension_numbers<[2], [2], [1], [1], [0, 0, 0, 1, 1, 1], [0], [0]>} : vector<2x8x32xf32>, vector<2x8x32xf32>, vector<2x8x8xf32> -> vector<2x8x8xf32>
    "tpu.trace_stop"() : () -> ()
    %c0_118 = arith.constant 0 : index
    %c0_119 = arith.constant 0 : index
    %c0_120 = arith.constant 0 : index
    %328 = vector.load %arg2[%c0_118, %c0_119, %c0_120] : memref<2x8x8xf32, #tpu.memory_space<vmem>>, vector<2x8x8xf32>
    tpu.vector_store %arg2[%c0_118, %c0_119, %c0_120], %327 {strides = array<i32>} : memref<2x8x8xf32, #tpu.memory_space<vmem>>, vector<2x8x8xf32>,
    return
  }
}

</mosaic_0001>

<bundles_post_ra>
// kernel: encoder_forward.1
= control target key start
LH: loop header
LB: loop body
LE: loop exit
PB: predicated region body
PF: predicated region fallthrough
CT: control target
= control target key end

     0   :  { %v1477_v7 = vmov 0.0   ;;  %s1731_s0 = inlined_call_operand.vmem [shape: f32[8,2,256], index: 0, kind: input, shape index: {}]   ;;  %s1732_s1 = inlined_call_operand.vmem [shape: f32[64,256], index: 1, kind: input, shape index: {}]   ;;  %s1733_s2 = inlined_call_operand.hbm [shape: f32[2,8,8], index: 2, kind: output, shape index: {}]  }
   0x1   :  { %v13_v0 = vld [vmem:[%s1732_s1 + $0x8] sm:$0xff]  ;;  %v15_v1 = vld [vmem:[%s1732_s1 + $0x18] sm:$0xff]  ;;  %v12_v2 = vld [vmem:[%s1732_s1] sm:$0xff]  ;;  %97 = vmatprep.mubr.f32.mxu0 %v1477_v7  ;;  %216 = vmatprep.mubr.f32.mxu1 %v1477_v7 }
   0x2   :  { %v1510_v3 = vpack.c.bf16 %v15_v1, %v13_v0  ;;  %v14_v4 = vld [vmem:[%s1732_s1 + $0x10] sm:$0xff]  ;;  %v17_v5 = vld [vmem:[%s1732_s1 + $0x28] sm:$0xff]  ;;  %v19_v6 = vld [vmem:[%s1732_s1 + $0x38] sm:$0xff] }
   0x3   :  { %v1523_v8 = vpack.c.bf16 %v14_v4, %v12_v2  ;;  %v1525_v9 = vpack.c.bf16 %v19_v6, %v17_v5  ;;  %v16_v10 = vld [vmem:[%s1732_s1 + $0x20] sm:$0xff]  ;;  %v18_v11 = vld [vmem:[%s1732_s1 + $0x30] sm:$0xff]  ;;  %v21_v12 = vld [vmem:[%s1732_s1 + $0x48] sm:$0xff] }
   0x4   :  { %1245 = vmatprep.subr.bf16.mxu0 %v1510_v3  ;;  %v23_v13 = vld [vmem:[%s1732_s1 + $0x58] sm:$0xff]  ;;  %1261 = vmatprep.subr.bf16.mxu1 %v1510_v3  ;;  %v1542_v14 = vpack.c.bf16 %v18_v11, %v16_v10  ;;  %v20_v16 = vld [vmem:[%s1732_s1 + $0x40] sm:$0xff]  ;;  %v22_v17 = vld [vmem:[%s1732_s1 + $0x50] sm:$0xff] }
   0x5   :  { %1247 = vmatpush1.bf16.msra.mxu0 %v1523_v8  ;;  %1263 = vmatpush1.bf16.msra.mxu1 %v1523_v8  ;;  %v1546_v15 = vpack.c.bf16 %v23_v13, %v21_v12 }
   0x6   :  { %1249 = vmatprep.subr.bf16.mxu0 %v1525_v9  ;;  %1265 = vmatprep.subr.bf16.mxu1 %v1525_v9 }
   0x7   :  { %7 = vsyncpa [#allocation4], 0  ;;  %v25_v18 = vld [vmem:[%s1732_s1 + $0x68] sm:$0xff]  ;;  %v27_v19 = vld [vmem:[%s1732_s1 + $0x78] sm:$0xff]  ;;  %v1562_v20 = vpack.c.bf16 %v22_v17, %v20_v16  ;;  %v1478_v25 = vmov 1983009808   ;;  %v110_v27 = vlaneseq }
   0x8   :  { %v1566_v21 = vpack.c.bf16 %v27_v19, %v25_v18  ;;  %v24_v22 = vld [vmem:[%s1732_s1 + $0x60] sm:$0xff]  ;;  %v26_v23 = vld [vmem:[%s1732_s1 + $0x70] sm:$0xff]  ;;  %v108_v26 = vunpack.c.l.s4 %v1478_v25  ;;  %s1479_s14 = smov 64   ;;  %vm145_vm0 = vcmask 517120   ;;  %vm29_vm1 = vcmask 523264   ;;  %s1483_s29 = smov [#allocation3]  }
   0x9   :  { %1251 = vmatpush1.bf16.msra.mxu0 %v1542_v14  ;;  %1267 = vmatpush1.bf16.msra.mxu1 %v1542_v14  ;;  %v1576_v24 = vpack.c.bf16 %v26_v23, %v24_v22  ;;  %v1595_v29 = vshrl.u32 %v110_v27, 7  ;;  %v28_v34 = vld [vmem:[%s1731_s0] sm:$0xf]  ;;  %v1212_v59 = vld [vmem:[%s1731_s0 + $0x4] sm:$0xf]  ;;  %vm1481_vm2 = vmmov 0  }
   0xa   :  { %1253 = vmatprep.subr.bf16.mxu0 %v1546_v15  ;;  %1269 = vmatprep.subr.bf16.mxu1 %v1546_v15  ;;  %v109_v28 = vunpack.c.0.s8 %v108_v26  ;;  %vm1041_vm3 = vcmask 261120   ;;  %s1201_s30 = sshll.u32 %s1483_s29, 4  ;;  %vm1193_vm4 = vcmask 64512   ;;  %s1202_s30 = int_to_ptr.vmem [resolvable:$true] %s1201_s30 }
   0xb   :  { %s1453_s3 = scalar_lea.vmem %s1202_s30, 256  ;;  %p1458_p1 = scmp.lt.s32.totalorder %s1202_s30, %s1202_s30 }
   0xc   :  { %v1598_v31 = vsub.s32 %v109_v28, %v1595_v29  ;;  %p1454_p0 = scmp.ne.s32.totalorder %s1202_s30, %s1453_s3  ;;  %p1459_p2 = scmp.lt.s32.totalorder %s1453_s3, %s1453_s3 }
   0xd   :  { %1255 = vmatpush1.bf16.msra.mxu0 %v1562_v20  ;;  %1271 = vmatpush1.bf16.msra.mxu1 %v1562_v20 }
   0xe   :  { %1257 = vmatprep.subr.bf16.mxu0 %v1566_v21  ;;  %1273 = vmatprep.subr.bf16.mxu1 %v1566_v21  ;;  %p1460_p3 = por %p1459_p2, %p1458_p1 }
  0x10   :  { %p1461_p4 = pnand %p1460_p3, %p1454_p0 }
  0x11   :  { %1259 = vmatpush1.bf16.msra.mxu0 %v1576_v24  ;;  %1275 = vmatpush1.bf16.msra.mxu1 %v1576_v24 }
  0x12   :  { %1277 = vmatprep.subr.bf16.mxu0 %v1510_v3  ;;  %1293 = vmatprep.subr.bf16.mxu1 %v1510_v3 }
  0x14   :  { %98 = vmatmul.mubr.f32.vlgmr.msra.gmra.mrb[0].mxu0 %v1477_v7 }
  0x15   :  { %1279 = vmatpush1.bf16.msra.mxu0 %v1523_v8  ;;  %335 = vmatprep.mubr.f32.mxu0 %v1477_v7 }
  0x16   :  { %1281 = vmatprep.subr.bf16.mxu0 %v1525_v9 }
  0x19   :  { %1283 = vmatpush1.bf16.msra.mxu0 %v1542_v14 }
  0x1a   :  { %1285 = vmatprep.subr.bf16.mxu0 %v1546_v15 }
  0x1d   :  { %1287 = vmatpush1.bf16.msra.mxu0 %v1562_v20 }
  0x1e   :  { %1289 = vmatprep.subr.bf16.mxu0 %v1566_v21 }
  0x21   :  { %1291 = vmatpush1.bf16.msra.mxu0 %v1576_v24 }
  0x22   :  { %1309 = vmatprep.subr.bf16.mxu0 %v1510_v3 }
  0xe7   :  { %v99_v30 = vpop.f32.mrb[0].mxu0 }
  0xe8   :  { %v101_v32 = vpop.f32.mrb[1].mxu0 }
  0xe9   :  { %v106_v33 = vcombine.low %v99_v30, %v101_v32  ;;  %v1214_v30 = vld [vmem:[%s1731_s0 + $0x8] sm:$0xf] }
  0xeb   :  { %v113_v35 = vrot.slane %v106_v33, %v1598_v31 }
  0xed   :  { %v115_v36 = vadd.f32 %v113_v35, %v28_v34 }
  0xef   :  { %v116_v37 = vmul.f32 0.5, %v115_v36  ;;  %v121_v38 = vrot.slane %v115_v36, 2 }
  0xf1   :  { %1385 = vtanh.f32 %v116_v37 }
  0xf2   :  { %1387 = vtanh.f32 %v121_v38 }
  0xfb   :  { %v1386_v39 = vpop.eup %1385 }
  0xfc   :  { %v118_v40 = vadd.f32 1.0, %v1386_v39  ;;  %v1388_v42 = vpop.eup %1387 }
  0xfe   :  { %v119_v41 = vmul.f32 0.5, %v118_v40 }
 0x100   :  { %v133_v43 = vmul.f32 %v1388_v42, %v119_v41  ;;  %v132_v44 = vmul.f32 0.0, %v119_v41 }
 0x102   :  { %135 = vrot.lane.b32.xlu0 %v133_v43, %s1479_s14 }
 0x106   :  { %124 = vrot.lane.b32.xlu0 %v115_v36, %s1479_s14 }
 0x174   :  { %v136_v45 = vpop.permute.xlu0 %135 }
 0x175   :  { %v138_v46 = vadd.f32 %v136_v45, %v132_v44 }
 0x177   :  { %1389 = vtanh.f32 %v138_v46 }
 0x178   :  { %v125_v48 = vpop.permute.xlu0 %124 }
 0x179   :  { %v126_v49 = vrot.slane %v125_v48, 2 }
 0x17b   :  { %v128_v50 = vmul.f32 0.5, %v126_v49 }
 0x17d   :  { %1391 = vtanh.f32 %v128_v50 }
 0x181   :  { %v1390_v47 = vpop.eup %1389 }
 0x182   :  { %141 = vrot.lane.b32.xlu1 %v1390_v47, %s1479_s14 }
 0x187   :  { %v1392_v51 = vpop.eup %1391 }
 0x188   :  { %v130_v52 = vadd.f32 1.0, %v1392_v51 }
 0x18a   :  { %v131_v53 = vmul.f32 0.5, %v130_v52 }
 0x1f4   :  { %v142_v54 = vpop.permute.xlu1 %141 }
 0x1f5   :  { %v144_v55 = vmul.f32 %v142_v54, %v131_v53 }
 0x1f7   :  { %146 = vst.msk [vmem:[#allocation2] sm:$0x3] %vm145_vm0, %v144_v55  ;;  %1213 = vmatmul.mubr.msk.f32.vlgmr.msra.gmra.mrb[0].mxu1 %vm29_vm1, %v144_v55 }
 0x1f8   :  { %1295 = vmatpush1.bf16.msra.mxu1 %v1523_v8  ;;  %454 = vmatprep.mubr.f32.mxu1 %v1477_v7 }
 0x1f9   :  { %1297 = vmatprep.subr.bf16.mxu1 %v1525_v9 }
 0x1fc   :  { %1299 = vmatpush1.bf16.msra.mxu1 %v1542_v14 }
 0x1fd   :  { %1301 = vmatprep.subr.bf16.mxu1 %v1546_v15 }
 0x200   :  { %1303 = vmatpush1.bf16.msra.mxu1 %v1562_v20 }
 0x201   :  { %1305 = vmatprep.subr.bf16.mxu1 %v1566_v21 }
 0x204   :  { %1307 = vmatpush1.bf16.msra.mxu1 %v1576_v24 }
 0x205   :  { %1325 = vmatprep.subr.bf16.mxu1 %v1510_v3 }
 0x2ca   :  { %v218_v56 = vpop.f32.mrb[0].mxu1 }
 0x2cb   :  { %v220_v57 = vpop.f32.mrb[1].mxu1 }
 0x2cc   :  { %v225_v58 = vcombine.low %v218_v56, %v220_v57  ;;  %v1216_v56 = vld [vmem:[%s1731_s0 + $0xc] sm:$0xf] }
 0x2ce   :  { %v232_v60 = vrot.slane %v225_v58, %v1598_v31 }
 0x2d0   :  { %v234_v61 = vadd.f32 %v1212_v59, %v232_v60 }
 0x2d2   :  { %243 = vrot.lane.b32.xlu0 %v234_v61, %s1479_s14  ;;  %v235_v62 = vmul.f32 0.5, %v234_v61  ;;  %v240_v63 = vrot.slane %v234_v61, 2 }
 0x2d4   :  { %1393 = vtanh.f32 %v235_v62 }
 0x2d5   :  { %1395 = vtanh.f32 %v240_v63 }
 0x2de   :  { %v1394_v0 = vpop.eup %1393 }
 0x2df   :  { %v237_v1 = vadd.f32 1.0, %v1394_v0  ;;  %v1396_v4 = vpop.eup %1395 }
 0x2e1   :  { %v238_v2 = vmul.f32 0.5, %v237_v1 }
 0x2e3   :  { %v252_v5 = vmul.f32 %v1396_v4, %v238_v2  ;;  %v251_v6 = vmul.f32 %v238_v2, %v138_v46 }
 0x2e5   :  { %254 = vrot.lane.b32.xlu1 %v252_v5, %s1479_s14 }
 0x344   :  { %v244_v13 = vpop.permute.xlu0 %243 }
 0x345   :  { %v245_v16 = vrot.slane %v244_v13, 2 }
 0x347   :  { %v247_v17 = vmul.f32 0.5, %v245_v16 }
 0x357   :  { %v255_v10 = vpop.permute.xlu1 %254 }
 0x358   :  { %v257_v11 = vadd.f32 %v255_v10, %v251_v6 }
 0x35a   :  { %1397 = vtanh.f32 %v257_v11 }
 0x35b   :  { %1399 = vtanh.f32 %v247_v17 }
 0x364   :  { %v1398_v12 = vpop.eup %1397 }
 0x365   :  { %260 = vrot.lane.b32.xlu1 %v1398_v12, %s1479_s14  ;;  %v1400_v18 = vpop.eup %1399 }
 0x366   :  { %v249_v19 = vadd.f32 1.0, %v1400_v18 }
 0x368   :  { %v250_v22 = vmul.f32 0.5, %v249_v19 }
 0x3d7   :  { %v261_v23 = vpop.permute.xlu1 %260 }
 0x3d8   :  { %v263_v25 = vmul.f32 %v261_v23, %v250_v22 }
 0x3da   :  { %265 = vst.msk [vmem:[#allocation2 + $0x2] sm:$0x3] %vm145_vm0, %v263_v25  ;;  %1215 = vmatmul.mubr.msk.f32.vlgmr.msra.gmra.mrb[2].mxu0 %vm29_vm1, %v263_v25  ;;  %v1218_v25 = vld [vmem:[%s1731_s0 + $0x10] sm:$0xf] }
 0x3db   :  { %1311 = vmatpush1.bf16.msra.mxu0 %v1523_v8  ;;  %573 = vmatprep.mubr.f32.mxu0 %v1477_v7 }
 0x3dc   :  { %1313 = vmatprep.subr.bf16.mxu0 %v1525_v9 }
 0x3df   :  { %1315 = vmatpush1.bf16.msra.mxu0 %v1542_v14 }
 0x3e0   :  { %1317 = vmatprep.subr.bf16.mxu0 %v1546_v15 }
 0x3e3   :  { %1319 = vmatpush1.bf16.msra.mxu0 %v1562_v20 }
 0x3e4   :  { %1321 = vmatprep.subr.bf16.mxu0 %v1566_v21 }
 0x3e7   :  { %1323 = vmatpush1.bf16.msra.mxu0 %v1576_v24 }
 0x3e8   :  { %1341 = vmatprep.subr.bf16.mxu0 %v1510_v3 }
 0x4ad   :  { %v337_v26 = vpop.f32.mrb[2].mxu0 }
 0x4ae   :  { %v339_v27 = vpop.f32.mrb[3].mxu0 }
 0x4af   :  { %v344_v28 = vcombine.low %v337_v26, %v339_v27 }
 0x4b1   :  { %v351_v32 = vrot.slane %v344_v28, %v1598_v31 }
 0x4b3   :  { %v353_v33 = vadd.f32 %v1214_v30, %v351_v32 }
 0x4b5   :  { %362 = vrot.lane.b32.xlu1 %v353_v33, %s1479_s14  ;;  %v354_v34 = vmul.f32 0.5, %v353_v33  ;;  %v359_v35 = vrot.slane %v353_v33, 2 }
 0x4b7   :  { %1401 = vtanh.f32 %v354_v34 }
 0x4b8   :  { %1403 = vtanh.f32 %v359_v35 }
 0x4c1   :  { %v1402_v36 = vpop.eup %1401 }
 0x4c2   :  { %v356_v37 = vadd.f32 1.0, %v1402_v36  ;;  %v1404_v39 = vpop.eup %1403 }
 0x4c4   :  { %v357_v38 = vmul.f32 0.5, %v356_v37 }
 0x4c6   :  { %v371_v40 = vmul.f32 %v1404_v39, %v357_v38  ;;  %v370_v41 = vmul.f32 %v357_v38, %v257_v11 }
 0x4c8   :  { %373 = vrot.lane.b32.xlu0 %v371_v40, %s1479_s14 }
 0x527   :  { %v363_v45 = vpop.permute.xlu1 %362 }
 0x528   :  { %v364_v46 = vrot.slane %v363_v45, 2 }
 0x52a   :  { %v366_v47 = vmul.f32 0.5, %v364_v46 }
 0x53a   :  { %v374_v42 = vpop.permute.xlu0 %373 }
 0x53b   :  { %v376_v43 = vadd.f32 %v374_v42, %v370_v41 }
 0x53d   :  { %1405 = vtanh.f32 %v376_v43 }
 0x53e   :  { %1407 = vtanh.f32 %v366_v47 }
 0x547   :  { %v1406_v44 = vpop.eup %1405 }
 0x548   :  { %379 = vrot.lane.b32.xlu0 %v1406_v44, %s1479_s14  ;;  %v1408_v48 = vpop.eup %1407 }
 0x549   :  { %v368_v49 = vadd.f32 1.0, %v1408_v48 }
 0x54b   :  { %v369_v50 = vmul.f32 0.5, %v368_v49 }
 0x5ba   :  { %v380_v51 = vpop.permute.xlu0 %379 }
 0x5bb   :  { %v382_v52 = vmul.f32 %v380_v51, %v369_v50 }
 0x5bd   :  { %384 = vst.msk [vmem:[#allocation2 + $0x4] sm:$0x3] %vm145_vm0, %v382_v52  ;;  %1217 = vmatmul.mubr.msk.f32.vlgmr.msra.gmra.mrb[2].mxu1 %vm29_vm1, %v382_v52 }
 0x5be   :  { %1327 = vmatpush1.bf16.msra.mxu1 %v1523_v8  ;;  %692 = vmatprep.mubr.f32.mxu1 %v1477_v7 }
 0x5bf   :  { %1329 = vmatprep.subr.bf16.mxu1 %v1525_v9 }
 0x5c2   :  { %1331 = vmatpush1.bf16.msra.mxu1 %v1542_v14 }
 0x5c3   :  { %1333 = vmatprep.subr.bf16.mxu1 %v1546_v15 }
 0x5c6   :  { %1335 = vmatpush1.bf16.msra.mxu1 %v1562_v20 }
 0x5c7   :  { %1337 = vmatprep.subr.bf16.mxu1 %v1566_v21 }
 0x5ca   :  { %1339 = vmatpush1.bf16.msra.mxu1 %v1576_v24 }
 0x5cb   :  { %1357 = vmatprep.subr.bf16.mxu1 %v1510_v3 }
 0x690   :  { %v456_v53 = vpop.f32.mrb[2].mxu1 }
 0x691   :  { %v458_v54 = vpop.f32.mrb[3].mxu1 }
 0x692   :  { %v463_v55 = vcombine.low %v456_v53, %v458_v54 }
 0x694   :  { %v470_v57 = vrot.slane %v463_v55, %v1598_v31 }
 0x696   :  { %v472_v58 = vadd.f32 %v1216_v56, %v470_v57 }
 0x698   :  { %481 = vrot.lane.b32.xlu0 %v472_v58, %s1479_s14  ;;  %v473_v59 = vmul.f32 0.5, %v472_v58  ;;  %v478_v60 = vrot.slane %v472_v58, 2 }
 0x69a   :  { %1409 = vtanh.f32 %v473_v59 }
 0x69b   :  { %1411 = vtanh.f32 %v478_v60 }
 0x6a4   :  { %v1410_v61 = vpop.eup %1409 }
 0x6a5   :  { %v475_v62 = vadd.f32 1.0, %v1410_v61  ;;  %v1412_v3 = vpop.eup %1411 }
 0x6a7   :  { %v476_v63 = vmul.f32 0.5, %v475_v62 }
 0x6a9   :  { %v490_v0 = vmul.f32 %v1412_v3, %v476_v63  ;;  %v489_v1 = vmul.f32 %v476_v63, %v376_v43 }
 0x6ab   :  { %492 = vrot.lane.b32.xlu1 %v490_v0, %s1479_s14 }
 0x70a   :  { %v482_v6 = vpop.permute.xlu0 %481 }
 0x70b   :  { %v483_v10 = vrot.slane %v482_v6, 2  ;;  %v1222_v6 = vld [vmem:[%s1731_s0 + $0x18] sm:$0xf] }
 0x70d   :  { %v485_v11 = vmul.f32 0.5, %v483_v10 }
 0x71d   :  { %v493_v2 = vpop.permute.xlu1 %492 }
 0x71e   :  { %v495_v4 = vadd.f32 %v493_v2, %v489_v1 }
 0x720   :  { %1413 = vtanh.f32 %v495_v4 }
 0x721   :  { %1415 = vtanh.f32 %v485_v11 }
 0x72a   :  { %v1414_v5 = vpop.eup %1413 }
 0x72b   :  { %498 = vrot.lane.b32.xlu1 %v1414_v5, %s1479_s14  ;;  %v1416_v12 = vpop.eup %1415 }
 0x72c   :  { %v487_v13 = vadd.f32 1.0, %v1416_v12 }
 0x72e   :  { %v488_v16 = vmul.f32 0.5, %v487_v13 }
 0x79d   :  { %v499_v17 = vpop.permute.xlu1 %498 }
 0x79e   :  { %v501_v18 = vmul.f32 %v499_v17, %v488_v16 }
 0x7a0   :  { %503 = vst.msk [vmem:[#allocation2 + $0x6] sm:$0x3] %vm145_vm0, %v501_v18  ;;  %1219 = vmatmul.mubr.msk.f32.vlgmr.msra.gmra.mrb[4].mxu0 %vm29_vm1, %v501_v18 }
 0x7a1   :  { %1343 = vmatpush1.bf16.msra.mxu0 %v1523_v8  ;;  %811 = vmatprep.mubr.f32.mxu0 %v1477_v7 }
 0x7a2   :  { %1345 = vmatprep.subr.bf16.mxu0 %v1525_v9 }
 0x7a5   :  { %1347 = vmatpush1.bf16.msra.mxu0 %v1542_v14 }
 0x7a6   :  { %1349 = vmatprep.subr.bf16.mxu0 %v1546_v15 }
 0x7a9   :  { %1351 = vmatpush1.bf16.msra.mxu0 %v1562_v20 }
 0x7aa   :  { %1353 = vmatprep.subr.bf16.mxu0 %v1566_v21 }
 0x7ad   :  { %1355 = vmatpush1.bf16.msra.mxu0 %v1576_v24 }
 0x7ae   :  { %1234 = vmatprep.subr.mxu0 %v1477_v7 }
 0x873   :  { %v575_v19 = vpop.f32.mrb[4].mxu0 }
 0x874   :  { %v577_v22 = vpop.f32.mrb[5].mxu0 }
 0x875   :  { %v582_v23 = vcombine.low %v575_v19, %v577_v22 }
 0x877   :  { %v589_v26 = vrot.slane %v582_v23, %v1598_v31 }
 0x879   :  { %v591_v27 = vadd.f32 %v1218_v25, %v589_v26 }
 0x87b   :  { %600 = vrot.lane.b32.xlu1 %v591_v27, %s1479_s14  ;;  %v592_v28 = vmul.f32 0.5, %v591_v27  ;;  %v597_v30 = vrot.slane %v591_v27, 2 }
 0x87d   :  { %1417 = vtanh.f32 %v592_v28 }
 0x87e   :  { %1419 = vtanh.f32 %v597_v30 }
 0x887   :  { %v1418_v32 = vpop.eup %1417 }
 0x888   :  { %v594_v33 = vadd.f32 1.0, %v1418_v32  ;;  %v1420_v35 = vpop.eup %1419 }
 0x88a   :  { %v595_v34 = vmul.f32 0.5, %v594_v33 }
 0x88c   :  { %v609_v36 = vmul.f32 %v1420_v35, %v595_v34  ;;  %v608_v37 = vmul.f32 %v595_v34, %v495_v4 }
 0x88e   :  { %611 = vrot.lane.b32.xlu0 %v609_v36, %s1479_s14 }
 0x8ed   :  { %v601_v41 = vpop.permute.xlu1 %600 }
 0x8ee   :  { %v602_v42 = vrot.slane %v601_v41, 2  ;;  %v1224_v41 = vld [vmem:[%s1731_s0 + $0x1c] sm:$0xf] }
 0x8f0   :  { %v604_v43 = vmul.f32 0.5, %v602_v42 }
 0x900   :  { %v612_v38 = vpop.permute.xlu0 %611 }
 0x901   :  { %v614_v39 = vadd.f32 %v612_v38, %v608_v37 }
 0x903   :  { %1421 = vtanh.f32 %v614_v39 }
 0x904   :  { %1423 = vtanh.f32 %v604_v43 }
 0x90d   :  { %v1422_v40 = vpop.eup %1421 }
 0x90e   :  { %617 = vrot.lane.b32.xlu0 %v1422_v40, %s1479_s14  ;;  %v1424_v44 = vpop.eup %1423 }
 0x90f   :  { %v606_v45 = vadd.f32 1.0, %v1424_v44 }
 0x911   :  { %v607_v46 = vmul.f32 0.5, %v606_v45 }
 0x980   :  { %v618_v47 = vpop.permute.xlu0 %617 }
 0x981   :  { %v620_v48 = vmul.f32 %v618_v47, %v607_v46 }
 0x983   :  { %622 = vst.msk [vmem:[#allocation2 + $0x8] sm:$0x3] %vm145_vm0, %v620_v48  ;;  %1221 = vmatmul.mubr.msk.f32.vlgmr.msra.gmra.mrb[4].mxu1 %vm29_vm1, %v620_v48 }
 0x984   :  { %1359 = vmatpush1.bf16.msra.mxu1 %v1523_v8  ;;  %930 = vmatprep.mubr.f32.mxu1 %v1477_v7  ;;  %v1220_v8 = vld [vmem:[%s1731_s0 + $0x14] sm:$0xf]  ;;  %s1482_s0 = smov 96  }
 0x985   :  { %1361 = vmatprep.subr.bf16.mxu1 %v1525_v9 }
 0x988   :  { %1363 = vmatpush1.bf16.msra.mxu1 %v1542_v14 }
 0x989   :  { %1365 = vmatprep.subr.bf16.mxu1 %v1546_v15 }
 0x98c   :  { %1367 = vmatpush1.bf16.msra.mxu1 %v1562_v20 }
 0x98d   :  { %1369 = vmatprep.subr.bf16.mxu1 %v1566_v21 }
 0x990   :  { %1371 = vmatpush1.bf16.msra.mxu1 %v1576_v24 }
 0x991   :  { %1239 = vmatprep.subr.mxu1 %v1477_v7 }
 0xa56   :  { %v694_v49 = vpop.f32.mrb[4].mxu1 }
 0xa57   :  { %v696_v50 = vpop.f32.mrb[5].mxu1 }
 0xa58   :  { %v701_v51 = vcombine.low %v694_v49, %v696_v50 }
 0xa5a   :  { %v708_v9 = vrot.slane %v701_v51, %v1598_v31 }
 0xa5c   :  { %v710_v14 = vadd.f32 %v1220_v8, %v708_v9 }
 0xa5e   :  { %719 = vrot.lane.b32.xlu0 %v710_v14, %s1479_s14  ;;  %v711_v15 = vmul.f32 0.5, %v710_v14  ;;  %v716_v20 = vrot.slane %v710_v14, 2 }
 0xa60   :  { %1425 = vtanh.f32 %v711_v15 }
 0xa61   :  { %1427 = vtanh.f32 %v716_v20 }
 0xa6a   :  { %v1426_v21 = vpop.eup %1425 }
 0xa6b   :  { %v713_v24 = vadd.f32 1.0, %v1426_v21  ;;  %v1428_v53 = vpop.eup %1427 }
 0xa6d   :  { %v714_v52 = vmul.f32 0.5, %v713_v24 }
 0xa6f   :  { %v728_v54 = vmul.f32 %v1428_v53, %v714_v52  ;;  %v727_v55 = vmul.f32 %v714_v52, %v614_v39 }
 0xa71   :  { %730 = vrot.lane.b32.xlu1 %v728_v54, %s1479_s14 }
 0xad0   :  { %v720_v59 = vpop.permute.xlu0 %719 }
 0xad1   :  { %v721_v60 = vrot.slane %v720_v59, 2 }
 0xad3   :  { %v723_v61 = vmul.f32 0.5, %v721_v60 }
 0xae3   :  { %v731_v56 = vpop.permute.xlu1 %730 }
 0xae4   :  { %v733_v57 = vadd.f32 %v731_v56, %v727_v55  ;;  %v1449_v55 = vld.sshfl [vmem:[#allocation2 + $0x2] sm:$0xf pattern:$0x76325410]  ;;  %v1480_v56 = vmov 1934713408  }
 0xae6   :  { %1429 = vtanh.f32 %v733_v57 }
 0xae7   :  { %1431 = vtanh.f32 %v723_v61 }
 0xaf0   :  { %v1430_v58 = vpop.eup %1429 }
 0xaf1   :  { %736 = vrot.lane.b32.xlu1 %v1430_v58, %s1479_s14  ;;  %v1432_v62 = vpop.eup %1431  ;;  %v1450_v58 = vld.sshfl [vmem:[#allocation2] sm:$0xf pattern:$0x76325410] }
 0xaf2   :  { %v725_v63 = vadd.f32 1.0, %v1432_v62  ;;  %v1020_v62 = vcombine.low %v1450_v58, %v1449_v55 }
 0xaf4   :  { %v726_v3 = vmul.f32 0.5, %v725_v63 }
 0xb63   :  { %v737_v0 = vpop.permute.xlu1 %736 }
 0xb64   :  { %v739_v1 = vmul.f32 %v737_v0, %v726_v3 }
 0xb66   :  { %741 = vst.msk [vmem:[#allocation2 + $0xa] sm:$0x3] %vm145_vm0, %v739_v1  ;;  %1223 = vmatmul.mubr.msk.f32.vlgmr.msra.gmra.mrb[6].mxu0 %vm29_vm1, %v739_v1 }
 0xb67   :  { %1236 = vmatprep.mubr.msk.f32.mxu0 %vm1481_vm2, %v1477_v7 }
 0xc39   :  { %v813_v2 = vpop.f32.mrb[6].mxu0 }
 0xc3a   :  { %v815_v4 = vpop.f32.mrb[7].mxu0 }
 0xc3b   :  { %v820_v5 = vcombine.low %v813_v2, %v815_v4 }
 0xc3d   :  { %v827_v10 = vrot.slane %v820_v5, %v1598_v31 }
 0xc3f   :  { %v829_v11 = vadd.f32 %v1222_v6, %v827_v10 }
 0xc41   :  { %838 = vrot.lane.b32.xlu1 %v829_v11, %s1479_s14  ;;  %v830_v12 = vmul.f32 0.5, %v829_v11  ;;  %v835_v13 = vrot.slane %v829_v11, 2 }
 0xc43   :  { %1433 = vtanh.f32 %v830_v12 }
 0xc44   :  { %1435 = vtanh.f32 %v835_v13 }
 0xc4d   :  { %v1434_v16 = vpop.eup %1433 }
 0xc4e   :  { %v832_v17 = vadd.f32 1.0, %v1434_v16  ;;  %v1436_v19 = vpop.eup %1435 }
 0xc50   :  { %v833_v18 = vmul.f32 0.5, %v832_v17 }
 0xc52   :  { %v847_v22 = vmul.f32 %v1436_v19, %v833_v18  ;;  %v846_v23 = vmul.f32 %v833_v18, %v733_v57  ;;  %v1022_v57 = vunpack.c.l.s4 %v1480_v56 }
 0xc54   :  { %849 = vrot.lane.b32.xlu0 %v847_v22, %s1479_s14  ;;  %v1023_v60 = vunpack.c.0.s8 %v1022_v57 }
 0xc56   :  { %v1026_v63 = vsub.s32 %v1023_v60, %v1595_v29 }
 0xc58   :  { %v1027_v0 = vrot.slane %v1020_v62, %v1026_v63 }
 0xcb3   :  { %v839_v28 = vpop.permute.xlu1 %838 }
 0xcb4   :  { %v840_v30 = vrot.slane %v839_v28, 2 }
 0xcb6   :  { %v842_v32 = vmul.f32 0.5, %v840_v30 }
 0xcc6   :  { %v850_v25 = vpop.permute.xlu0 %849 }
 0xcc7   :  { %v852_v26 = vadd.f32 %v850_v25, %v846_v23 }
 0xcc9   :  { %1437 = vtanh.f32 %v852_v26 }
 0xcca   :  { %1439 = vtanh.f32 %v842_v32 }
 0xcd3   :  { %v1438_v27 = vpop.eup %1437 }
 0xcd4   :  { %855 = vrot.lane.b32.xlu0 %v1438_v27, %s1479_s14  ;;  %v1440_v33 = vpop.eup %1439 }
 0xcd5   :  { %v844_v34 = vadd.f32 1.0, %v1440_v33 }
 0xcd7   :  { %v845_v35 = vmul.f32 0.5, %v844_v34 }
 0xd46   :  { %v856_v36 = vpop.permute.xlu0 %855 }
 0xd47   :  { %v858_v37 = vmul.f32 %v856_v36, %v845_v35 }
 0xd49   :  { %860 = vst.msk [vmem:[#allocation2 + $0xc] sm:$0x3] %vm145_vm0, %v858_v37  ;;  %1225 = vmatmul.mubr.msk.f32.vlgmr.msra.gmra.mrb[6].mxu1 %vm29_vm1, %v858_v37 }
 0xd4a   :  { %1241 = vmatprep.mubr.msk.f32.mxu1 %vm1481_vm2, %v1477_v7 }
 0xd50   :  { %v1451_v59 = vld.sshfl [vmem:[#allocation2 + $0x8] sm:$0xf pattern:$0x76325410] }
 0xe1c   :  { %v932_v38 = vpop.f32.mrb[6].mxu1 }
 0xe1d   :  { %v934_v39 = vpop.f32.mrb[7].mxu1 }
 0xe1e   :  { %v939_v40 = vcombine.low %v932_v38, %v934_v39 }
 0xe20   :  { %v946_v42 = vrot.slane %v939_v40, %v1598_v31 }
 0xe22   :  { %v948_v43 = vadd.f32 %v1224_v41, %v946_v42 }
 0xe24   :  { %957 = vrot.lane.b32.xlu0 %v948_v43, %s1479_s14  ;;  %v949_v44 = vmul.f32 0.5, %v948_v43  ;;  %v954_v45 = vrot.slane %v948_v43, 2 }
 0xe26   :  { %1441 = vtanh.f32 %v949_v44 }
 0xe27   :  { %1443 = vtanh.f32 %v954_v45 }
 0xe30   :  { %v1442_v46 = vpop.eup %1441 }
 0xe31   :  { %v951_v47 = vadd.f32 1.0, %v1442_v46  ;;  %v1444_v49 = vpop.eup %1443 }
 0xe33   :  { %v952_v48 = vmul.f32 0.5, %v951_v47 }
 0xe35   :  { %v966_v50 = vmul.f32 %v1444_v49, %v952_v48  ;;  %v965_v51 = vmul.f32 %v952_v48, %v852_v26 }
 0xe37   :  { %968 = vrot.lane.b32.xlu1 %v966_v50, %s1479_s14 }
 0xe96   :  { %v958_v31 = vpop.permute.xlu0 %957 }
 0xe97   :  { %v959_v15 = vrot.slane %v958_v31, 2 }
 0xe99   :  { %v961_v20 = vmul.f32 0.5, %v959_v15 }
 0xea9   :  { %v969_v8 = vpop.permute.xlu1 %968 }
 0xeaa   :  { %v971_v9 = vadd.f32 %v969_v8, %v965_v51 }
 0xeac   :  { %1445 = vtanh.f32 %v971_v9 }
 0xead   :  { %1447 = vtanh.f32 %v961_v20 }
 0xeb6   :  { %v1446_v14 = vpop.eup %1445 }
 0xeb7   :  { %974 = vrot.lane.b32.xlu1 %v1446_v14, %s1479_s14  ;;  %v1448_v21 = vpop.eup %1447 }
 0xeb8   :  { %v963_v24 = vadd.f32 1.0, %v1448_v21 }
 0xeba   :  { %v964_v52 = vmul.f32 0.5, %v963_v24 }
 0xf29   :  { %v975_v53 = vpop.permute.xlu1 %974 }
 0xf2a   :  { %v977_v54 = vmul.f32 %v975_v53, %v964_v52 }
 0xf2c   :  { %979 = vst.msk [vmem:[#allocation2 + $0xe] sm:$0x3] %vm145_vm0, %v977_v54 }
 0xf33   :  { %v1452_v61 = vld.sshfl [vmem:[#allocation2 + $0xa] sm:$0xf pattern:$0x76325410] }
 0xf34   :  { %v1028_v3 = vcombine.low %v1451_v59, %v1452_v61 }
 0xf36   :  { %v1035_v1 = vrot.slane %v1028_v3, %v1026_v63 }
 0xf38   :  { %v1037_v2 = vcombine.high %v1027_v0, %v1035_v1  ;;  %v1036_v4 = vcombine.low %v1027_v0, %v1035_v1 }
 0xf3a   :  { %1117 = vrot.lane.b32.xlu1 %v1037_v2, %s1482_s0  ;;  %1039 = vrot.lane.b32.xlu0 %v1036_v4, %s1482_s0 }
 0xfac   :  { %v1118_v5 = vpop.permute.xlu1 %1117  ;;  %v1040_v6 = vpop.permute.xlu0 %1039 }
 0xfad   :  { %1235 = vmatpush3.xpose.msk.msra.mxu0 %vm1041_vm3, %v1040_v6  ;;  %1240 = vmatpush3.xpose.msk.msra.mxu1 %vm1041_vm3, %v1118_v5 }
 0xfb0   :  { %1237 = vmatmul.mubr.msk.f32.vlgmr.msra.gmra.mrb[8].mxu0 %vm1041_vm3, %v1036_v4  ;;  %1242 = vmatmul.mubr.msk.f32.vlgmr.msra.gmra.mrb[8].mxu1 %vm1041_vm3, %v1037_v2 }
0x1083   :  { %v1112_v7 = vpop.f32.mrb[8].mxu0  ;;  %v1189_v29 = vpop.f32.mrb[8].mxu1 }
0x1084   :  { %1194 = vst.msk [vmem:[#allocation3] sm:$0xff] %vm1193_vm4, %v1112_v7  ;;  %1195 = vst.msk [vmem:[#allocation3 + $0x8] sm:$0xff] %vm1193_vm4, %v1189_v29  ;;  %v1238_v10 = vpop.f32.mrb[9].mxu0  ;;  %v1243_v11 = vpop.f32.mrb[9].mxu1 }
0x1085   :  { %1464 = shalt.err (!%p1461_p4)
}
0x1086   :  { %s1465_s6 = scalar_lea.hbm %s1733_s2, 256 }
0x1087   :  { %p1466_p5 = scmp.ne.s32.totalorder %s1733_s2, %s1465_s6  ;;  %p1469_p6 = scmp.lt.u32.totalorder %s1465_s6, %s1733_s2 }
0x1089   :  { %p1471_p7 = pnand %p1469_p6, %p1466_p5 }
0x108b   :  { %1474 = shalt.err (!%p1471_p7)
}
0x108c   :  { %s1484_s11 = smov 128   ;;  %s1485_s12 = smov 8  }
0x108d   :  { %1207 = dma.vmem_to_hbm [thread:$0]  %s1202_s30, 256, %s1733_s2, [#allocation4], %s1484_s11, %s1484_s11, %s1485_s12  }
0x108e   :  { %1475 = dma.done.wait [#allocation4], 256  }
0x108f   :  { %1476 = vsyncadd [#allocation4], 4294967040 }
0x1090   :  { %1211 = vsyncpa [#allocation4], 1 }

</bundles_post_ra>
